<compile_context>
chip_gen: v5e
topology: v5e:2x2
jax: 0.10.0
libtpu: 0.0.40
codegen_flags: <defaults>
</compile_context>

<pallas_src>
import jax
import jax.numpy as jnp
from jax.experimental import pallas as pl
from jax.experimental.pallas import tpu as pltpu


def _round_up(x: int, m: int) -> int:
    return (x + m - 1) // m * m


def patch_embed_kernel(p_ref, w_ref, b_ref, o_ref):
    # p_ref: (TM, Kp)  compute_dtype patch rows
    # w_ref: (Kp, Ep)  compute_dtype projection weight (pre-transposed, zero-padded)
    # b_ref: (1, Ep)   f32 bias
    # o_ref: (TM, Ep)  out rows (out_dtype; bf16 by default)
    acc = jnp.dot(p_ref[...], w_ref[...],
                  preferred_element_type=jnp.float32)        # MXU, f32 accumulate
    o_ref[...] = (acc + b_ref[...]).astype(o_ref.dtype)      # f32 bias add (VPU), then cast


def patch_embed_forward(x, weight, bias, *, patch_size,
                        compute_dtype=jnp.bfloat16, out_dtype=None,
                        row_tile_cap=1024):
    """PatchEmbed forward.

    x: (B, C, H, W). weight: (E, C, p, p) (PyTorch Conv2d layout). bias: (E,).
    Returns (B, num_patches, E) in out_dtype (default = compute_dtype).
    """
    if out_dtype is None:
        out_dtype = compute_dtype

    B, C, H, W = x.shape
    p = patch_size
    assert H % p == 0 and W % p == 0, "image size must be divisible by patch size"
    Hp, Wp = H // p, W // p
    Np = Hp * Wp
    E = weight.shape[0]
    K = C * p * p
    M = B * Np

    # Cast FIRST so the materialized im2col transpose reads and writes the
    # compute dtype (bf16: 4 B/elem of wrapper HBM traffic instead of 6).
    xc = x.astype(compute_dtype)
    # im2col: (B,C,H,W) -> (B,Hp,Wp,C,p,p) -> (M, K). (c,kh,kw) contraction order
    # matches the flattened Conv2d weight; (b,hp,wp) row order matches
    # .flatten(2).transpose(1,2) in the PyTorch forward.
    patches = xc.reshape(B, C, Hp, p, Wp, p)
    patches = jnp.transpose(patches, (0, 2, 4, 1, 3, 5)).reshape(M, K)

    w = jnp.transpose(weight.reshape(E, K), (1, 0)).astype(compute_dtype)   # (K, E)
    b2 = bias.reshape(1, E).astype(jnp.float32)                             # (1, E)

    # Zero-pad K and E to lane multiples (128) so the contraction loads and the
    # output stores are unmasked and lane-dense. No-op for standard ViT shapes.
    Kp = _round_up(K, 128)
    Ep = _round_up(E, 128)
    if Kp != K:
        patches = jnp.pad(patches, ((0, 0), (0, Kp - K)))
        w = jnp.pad(w, ((0, Kp - K), (0, 0)))
    if Ep != E:
        w = jnp.pad(w, ((0, 0), (0, Ep - E)))
        b2 = jnp.pad(b2, ((0, 0), (0, Ep - E)))

    # Row tile: cap at row_tile_cap, but always split into >= 2 grid steps so the
    # "parallel" axis shards across both TensorCores on v7x even at small batch.
    half = _round_up(pl.cdiv(M, 2), 8)
    TM = max(8, min(row_tile_cap, half))
    grid = (pl.cdiv(M, TM),)

    out = pl.pallas_call(
        patch_embed_kernel,
        out_shape=jax.ShapeDtypeStruct((M, Ep), out_dtype),
        grid_spec=pltpu.PrefetchScalarGridSpec(
            num_scalar_prefetch=0,
            grid=grid,
            in_specs=[
                pl.BlockSpec((TM, Kp), lambda i: (i, 0)),   # patch rows march with grid
                pl.BlockSpec((Kp, Ep), lambda i: (0, 0)),   # weight: constant block (resident)
                pl.BlockSpec((1, Ep), lambda i: (0, 0)),    # bias: constant block (resident)
            ],
            out_specs=pl.BlockSpec((TM, Ep), lambda i: (i, 0)),
        ),
        compiler_params=pltpu.CompilerParams(
            dimension_semantics=("parallel",)),
    )(patches, w, b2)

    if Ep != E:
        out = out[:, :E]
    return out.reshape(B, Np, E)


def patch_embed_reference(x, weight, bias, *, patch_size):
    """Pure-JAX f32 reference mirroring PyTorch: Conv2d -> flatten(2) -> transpose(1,2)."""
    p = patch_size
    y = jax.lax.conv_general_dilated(
        x, weight, window_strides=(p, p), padding="VALID",
        dimension_numbers=("NCHW", "OIHW", "NCHW"))           # (B, E, Hp, Wp)
    B, E, Hp, Wp = y.shape
    y = y.reshape(B, E, Hp * Wp).transpose(0, 2, 1)            # (B, Np, E)
    return y + bias


if __name__ == "__main__":
    # Small shapes consistent with the module: 16x16 image, 4x4 patches,
    # 3 input channels, embed_dim 32 -> 16 patches per image.
    B, C, IMG, P, E = 2, 3, 16, 4, 32

    key = jax.random.PRNGKey(0)
    kx, kw, kb = jax.random.split(key, 3)
    x = jax.random.normal(kx, (B, C, IMG, IMG), dtype=jnp.float32)
    weight = jax.random.normal(kw, (E, C, P, P), dtype=jnp.float32) * 0.05
    bias = jax.random.normal(kb, (E,), dtype=jnp.float32) * 0.01

    y = patch_embed_forward(x, weight, bias, patch_size=P)
    y = jax.block_until_ready(y)

    y_ref = patch_embed_reference(x, weight, bias, patch_size=P)
    Np = (IMG // P) * (IMG // P)
    assert y.shape == (B, Np, E)
    # bf16 MXU operands + bf16 output with f32 accumulation -> loosened tolerance.
    assert jnp.allclose(y.astype(jnp.float32), y_ref, atol=2e-2, rtol=2e-2), \
        "mismatch vs reference"

    print("KERNEL_OK")
</pallas_src>

<mosaic_0001>
module attributes {stable_mosaic.version = 11 : i64} {
  func.func @patch_embed_kernel(%arg0: i32, %arg1: memref<16x128xbf16, #tpu.memory_space<vmem>>, %arg2: memref<128x128xbf16, #tpu.memory_space<vmem>>, %arg3: memref<1x128xf32, #tpu.memory_space<vmem>>, %arg4: memref<16x128xbf16, #tpu.memory_space<vmem>>) attributes {dimension_semantics = [#tpu.dimension_semantics<parallel>], iteration_bounds = array<i64: 2>, scalar_prefetch = 0 : i64, scratch_operands = 0 : i64, tpu.core_type = #tpu.core_type<tc>, window_params = [{transform_indices = @transform_0, window_bounds = array<i64: 16, 128>}, {pipeline_mode = #tpu.pipeline_mode<synchronous>, transform_indices = @transform_1, window_bounds = array<i64: 128, 128>}, {pipeline_mode = #tpu.pipeline_mode<synchronous>, transform_indices = @transform_2, window_bounds = array<i64: 1, 128>}, {transform_indices = @transform_3, window_bounds = array<i64: 16, 128>}]} {
    %c0 = arith.constant 0 : index
    %c0_0 = arith.constant 0 : index
    %0 = vector.load %arg1[%c0, %c0_0] : memref<16x128xbf16, #tpu.memory_space<vmem>>, vector<16x128xbf16>
    %c0_1 = arith.constant 0 : index
    %c0_2 = arith.constant 0 : index
    %1 = vector.load %arg2[%c0_1, %c0_2] : memref<128x128xbf16, #tpu.memory_space<vmem>>, vector<128x128xbf16>
    %cst = arith.constant dense<0.000000e+00> : vector<16x128xf32>
    %2 = tpu.matmul %0, %1, %cst {dimension_numbers = #tpu.dot_dimension_numbers<[1], [0], [0], [1], [0, 0, 1, 1], [], []>} : vector<16x128xbf16>, vector<128x128xbf16>, vector<16x128xf32> -> vector<16x128xf32>
    %c0_3 = arith.constant 0 : index
    %c0_4 = arith.constant 0 : index
    %3 = vector.load %arg3[%c0_3, %c0_4] : memref<1x128xf32, #tpu.memory_space<vmem>>, vector<1x128xf32>
    %4 = vector.broadcast %3 : vector<1x128xf32> to vector<16x128xf32>
    %5 = arith.addf %2, %4 : vector<16x128xf32>
    %6 = arith.truncf %5 : vector<16x128xf32> to vector<16x128xbf16>
    %c0_5 = arith.constant 0 : index
    %c0_6 = arith.constant 0 : index
    %7 = vector.load %arg4[%c0_5, %c0_6] : memref<16x128xbf16, #tpu.memory_space<vmem>>, vector<16x128xbf16>
    tpu.vector_store %arg4[%c0_5, %c0_6], %6 {strides = array<i32>} : memref<16x128xbf16, #tpu.memory_space<vmem>>, vector<16x128xbf16>,
    return
  }
  func.func @transform_0(%arg0: i32) -> (i32, i32) {
    %c0_i32 = arith.constant 0 : i32
    %c0_i32_0 = arith.constant 0 : i32
    return %arg0, %c0_i32 : i32, i32
  }
  func.func @transform_1(%arg0: i32) -> (i32, i32) {
    %c0_i32 = arith.constant 0 : i32
    %c0_i32_0 = arith.constant 0 : i32
    %c0_i32_1 = arith.constant 0 : i32
    return %c0_i32, %c0_i32_0 : i32, i32
  }
  func.func @transform_2(%arg0: i32) -> (i32, i32) {
    %c0_i32 = arith.constant 0 : i32
    %c0_i32_0 = arith.constant 0 : i32
    %c0_i32_1 = arith.constant 0 : i32
    return %c0_i32, %c0_i32_0 : i32, i32
  }
  func.func @transform_3(%arg0: i32) -> (i32, i32) {
    %c0_i32 = arith.constant 0 : i32
    %c0_i32_0 = arith.constant 0 : i32
    return %arg0, %c0_i32 : i32, i32
  }
}

</mosaic_0001>

<bundles_post_ra>
// kernel: tpu_custom_call.1
= control target key start
LH: loop header
LB: loop body
LE: loop exit
PB: predicated region body
PF: predicated region fallthrough
CT: control target
= control target key end

     0   :  { %8 = vsyncpa [#allocation3], 0  ;;  %s837_s0 = inlined_call_operand.hbm [shape: bf16[32,128], index: 0, kind: input, shape index: {}]   ;;  %s838_s1 = inlined_call_operand.hbm [shape: bf16[128,128], index: 1, kind: input, shape index: {}]   ;;  %s839_s2 = inlined_call_operand.vmem [shape: f32[1,128], index: 2, kind: input, shape index: {}]   ;;  %s840_s3 = inlined_call_operand.hbm [shape: bf16[32,128], index: 3, kind: output, shape index: {}]  }
   0x1   :  { %10 = vsyncpa [#allocation3 + $0x1], 0 }
   0x2   :  { %11 = vsyncpa [#allocation6], 0 }
   0x3   :  { %12 = vsyncpa [#allocation4], 0 }
   0x4   :  { %14 = vsyncpa [#allocation4 + $0x1], 0  ;;  %s690_s12 = smov 0   ;;  %s692_s13 = smov 0  }
   0x5   :  { %s694_s14 = smov 0   ;;  %s696_s15 = smov 0  }
   0x6 LB: > { %s711_s16 = sadd.s32 4294967295, %s663_s15   ;;  %s403_s17 = sadd.s32 4294967294, %s663_s15   ;;  %s663_s15 = sphi %s696_s15, %s850_s15   ;;  %s659_s14 = sphi %s694_s14, %s849_s14   ;;  %s655_s13 = sphi %s692_s13, %s848_s13   ;;  %s651_s12 = sphi %s690_s12, %s847_s12  }
   0x7   : > { %p40_p0 = scmp.ne.s32.totalorder %s655_s13, %s651_s12  ;;  %p41_p1 = scmp.eq.s32.totalorder %s711_s16, 0 }
   0x8   : > { %p106_p2 = scmp.eq.s32.totalorder %s711_s16, 1  ;;  %p112_p3 = scmp.eq.s32.totalorder %s403_s17, 1 }
   0x9   : > { %p720_p4 = por %p41_p1, %p40_p0  ;;  %p404_p5 = scmp.ge.s32.totalorder %s663_s15, 1 }
   0xa   : > { %p725_p6 = por %p112_p3, %p40_p0  ;;  %p119_p7 = scmp.lt.s32.totalorder %s663_s15, 3 }
   0xb   : > { %s130_s22 = sshll.u32 %s838_s1, 4  ;;  %s665_s24 = smov [#allocation5]   ;;  %s131_s22 = int_to_ptr.hbm [resolvable:$true] %s130_s22 }
   0xc   : > { %p733_p8 = pnand %p404_p5, %p119_p7  ;;  %s132_s25 = sshll.u32 %s665_s24, 4  ;;  %s133_s25 = int_to_ptr.vmem [resolvable:$true] %s132_s25 }
   0xd   : > { %s743_s26 = sadd.s32 1, %s663_s15   ;;  %s666_s27 = smov 64  }
   0xe   : > { %p479_p9 = pneg %p733_p8  ;;  %s667_s28 = smov 4  }
   0xf   : > { %s24_s29 = ssub.s32 %s663_s15, %s743_s26  ;;  %s27_s30 = sadd.s32 1, %s659_s14 }
  0x10   : > { %p480_p10 = pnand %p479_p9, %p41_p1  ;;  %p25_p12 = scmp.eq.s32.totalorder %s24_s29, 0 }
  0x11   : > { %p34_p13 = scmp.ne.s32.totalorder %s659_s14, %s655_s13  ;;  %p35_p0 = scmp.eq.s32.totalorder %s663_s15, 0 }
  0x12   : > { %482 = dma.hbm_to_vmem [thread:$0]  (!%p480_p10), %s131_s22, 1024, %s133_s25, [#allocation6], %s666_s27, %s666_s27, %s667_s28  }
  0x13   : > { %s755_s4 = scalar_select %p25_p12, %s659_s14, %s27_s30  }
  0x14   : > { %p759_p3 = por %p106_p2, %p34_p13  ;;  %p492_p5 = scmp.lt.s32.totalorder %s663_s15, 2 }
  0x15   : > { %s149_s6 = sand.u32 1, %s659_s14   ;;  %s455_s7 = sshll.u32 %s663_s15, 3 }
  0x16   : > { %p36_p7 = por %p35_p0, %p34_p13  ;;  %s407_s8 = sshll.u32 %s149_s6, 3 }
  0x17   : > { %s158_s11 = scalar_lea.hbm %s837_s0, %s455_s7  ;;  %s153_s20 = scalar_lea.vmem [#allocation2], %s407_s8 }
  0x18   : > { %s159_s17 = sshll.u32 %s158_s11, 4  ;;  %s161_s21 = sshll.u32 %s153_s20, 4  ;;  %s160_s17 = int_to_ptr.hbm [resolvable:$true] %s159_s17  ;;  %s162_s21 = int_to_ptr.vmem [resolvable:$true] %s161_s21 }
  0x19   : > { %p769_p9 = pnand %p492_p5, %p36_p7  ;;  %s150_s24 = scalar_lea.sflag [#allocation3], %s149_s6 }
  0x1a   : > { %s563_s25 = sshra.s32 %s160_s17, 4  ;;  %s570_s8 = scalar_lea.hbm %s837_s0, 16  ;;  %s564_s25 = int_to_ptr.hbm [resolvable:$true] %s563_s25 }
  0x1b   : > { %s565_s29 = scalar_lea.hbm %s564_s25, 8  ;;  %p567_p10 = pneg %p769_p9 }
  0x1c   : > { %p566_p2 = scmp.ne.s32.totalorder %s564_s25, %s565_s29  ;;  %p571_p0 = scmp.lt.s32.totalorder %s564_s25, %s837_s0 }
  0x1d   : > { %p572_p5 = scmp.lt.s32.totalorder %s570_s8, %s565_s29 }
  0x1e   : > { %p568_p12 = pnand %p567_p10, %p566_p2 }
  0x1f   : > { %p573_p7 = por %p572_p5, %p571_p0 }
  0x20   : > { %p569_p13 = pneg %p568_p12 }
  0x22   : > { %p574_p11 = pnand %p573_p7, %p569_p13 }
  0x24   : > { %577 = shalt.err (!%p574_p11)
}
  0x25   : > { %486 = dma.hbm_to_vmem [thread:$0]  (!%p769_p9), %s160_s17, 128, %s162_s21, %s150_s24, %s666_s27, %s666_s27, %s667_s28  }
  0x26   : > { %173 = sbr.rel (%p733_p8) target bundleno = 220 (0xdc), region = 32  ;;  %s789_s6 = sand.u32 (!%p733_p8), 1, %s655_s13  }
  0x27   : > { %s411_s11 = sshll.u32 (!%p733_p8), %s789_s6, 3  ;;  %s176_s20 = scalar_lea.sflag (!%p733_p8), [#allocation3], %s789_s6 }
  0x28   : > { %s179_s25 = scalar_lea.vmem (!%p733_p8), [#allocation2], %s411_s11 }
  0x2b   : > { %638 = dma.done.wait (%p720_p4), %s176_s20, 128  }
  0x2c   : > { %640 = vsyncadd (%p720_p4), %s176_s20, 4294967168 }
  0x2d   : > { %642 = dma.done.wait (%p41_p1), [#allocation6], 1024  }
  0x2e   : > { %644 = vsyncadd (%p41_p1), [#allocation6], 4294966272  ;;  %v464_v0 = vld [vmem:[#allocation5 + $0x38] sm:$0xff]  ;;  %v463_v1 = vld [vmem:[#allocation5 + $0x30] sm:$0xff]  ;;  %s465_s18 = sshll.u32 %s711_s16, 3  ;;  %s207_s22 = scalar_lea.vmem [#allocation7], %s411_s11 }
  0x2f   : > { %286 = vmatpush.bf16.msra.mxu0 %v464_v0  ;;  %v462_v2 = vld [vmem:[#allocation5 + $0x28] sm:$0xff]  ;;  %v461_v3 = vld [vmem:[#allocation5 + $0x20] sm:$0xff]  ;;  %v460_v4 = vld [vmem:[#allocation5 + $0x18] sm:$0xff]  ;;  %s316_s28 = scalar_lea.hbm %s840_s3, %s465_s18  ;;  %s317_s24 = sshll.u32 %s207_s22, 4  ;;  %s318_s24 = int_to_ptr.vmem [resolvable:$true] %s317_s24 }
  0x30   : > { %v459_v5 = vld [vmem:[#allocation5 + $0x10] sm:$0xff]  ;;  %v458_v6 = vld [vmem:[#allocation5 + $0x8] sm:$0xff]  ;;  %v457_v7 = vld [vmem:[#allocation5] sm:$0xff]  ;;  %s319_s29 = sshll.u32 %s316_s28, 4  ;;  %s305_s16 = scalar_lea.sflag [#allocation4], %s789_s6  ;;  %s320_s29 = int_to_ptr.hbm [resolvable:$true] %s319_s29 }
  0x31   : > { %v456_v8 = vld [vmem:[%s179_s25] sm:$0xff]  ;;  %s607_s30 = sshra.s32 %s320_s29, 4  ;;  %s613_s10 = scalar_lea.hbm %s840_s3, 16  ;;  %s608_s30 = int_to_ptr.hbm [resolvable:$true] %s607_s30 }
  0x32   : > { %v532_v10 = vld [vmem:[%s839_s2] ss:$0 sm:$0xff]  ;;  %s609_s7 = scalar_lea.hbm %s608_s30, 8  ;;  %p614_p11 = scmp.lt.s32.totalorder %s608_s30, %s840_s3 }
  0x33   : > { %287 = vmatpush.bf16.msra.mxu0 %v463_v1  ;;  %p610_p1 = scmp.ne.s32.totalorder %s608_s30, %s609_s7  ;;  %p615_p9 = scmp.lt.s32.totalorder %s613_s10, %s609_s7 }
  0x35   : > { %p611_p4 = pnand %p610_p1, %p759_p3  ;;  %p616_p2 = por %p615_p9, %p614_p11 }
  0x37   : > { %288 = vmatpush.bf16.msra.mxu0 %v462_v2  ;;  %p612_p8 = pneg %p611_p4 }
  0x39   : > { %p617_p10 = pnand %p616_p2, %p612_p8 }
  0x3b   : > { %289 = vmatpush.bf16.msra.mxu0 %v461_v3 }
  0x3f   : > { %290 = vmatpush.bf16.msra.mxu0 %v460_v4 }
  0x43   : > { %291 = vmatpush.bf16.msra.mxu0 %v459_v5 }
  0x47   : > { %292 = vmatpush.bf16.msra.mxu0 %v458_v6 }
  0x4b   : > { %293 = vmatpush.bf16.msra.mxu0 %v457_v7 }
  0x4e   : > { %294 = vmatmul.bf16.vlgmr.msra.gmra.mxu0 %v456_v8 }
  0xcb   : > { %v295_v9 = vpop.f32.mrf.mxu0 }
  0xcc   : > { %v296_v12 = vadd.f32 %v532_v10, %v295_v9 }
  0xd3   : > { %v297_v11 = vpop.f32.mrf.mxu0 }
  0xd4   : > { %v298_v13 = vadd.f32 %v532_v10, %v297_v11 }
  0xd6   : > { %v469_v14 = vpack.c.bf16 %v298_v13, %v296_v12 }
  0xd8   : > { %470 = vst [vmem:[%s207_s22] sm:$0xff] %v469_v14  }
  0xd9   : > { %620 = shalt.err (!%p617_p10)
}
  0xda   : > { %s668_s6 = smov 64   ;;  %s669_s25 = smov 4  }
  0xdb   : > { %477 = dma.vmem_to_hbm [thread:$0]  (%p759_p3), %s318_s24, 128, %s320_s29, %s305_s16, %s668_s6, %s668_s6, %s669_s25  }
  0xdc PF: > { %s334_s18 = sand.u32 1, %s651_s12   ;;  %p846_p12 = scmp.ge.s32.totalorder %s663_s15, 2 }
  0xdd   : > { %s335_s23 = scalar_lea.sflag [#allocation4], %s334_s18 }
  0xde   : > { %p488_p13 = pnand %p846_p12, %p725_p6 }
  0xe0   : > { %p489_p0 = pneg %p488_p13 }
  0xe2   : > { %646 = dma.done.wait (%p489_p0), %s335_s23, 128  }
  0xe3   : > { %648 = vsyncadd (%p489_p0), %s335_s23, 4294967168  ;;  %p17_p5 = scmp.ge.s32.totalorder %s743_s26, 4   ;;  %s847_s12 = smov %s655_s13 }
  0xe4   : > { %s848_s13 = smov %s659_s14  ;;  %s849_s14 = smov %s755_s4 }
  0xe5   : > { %s850_s15 = smov %s743_s26  ;;  %19 = sbr.rel (!%p17_p5) target bundleno = 6 (0x6), region = 81 }
  0xea   :  { %341 = vsyncpa [#allocation3], 1 }
  0xeb   :  { %343 = vsyncpa [#allocation3 + $0x1], 1 }
  0xec   :  { %344 = vsyncpa [#allocation6], 1 }
  0xed   :  { %345 = vsyncpa [#allocation4], 1 }
  0xee   :  { %347 = vsyncpa [#allocation4 + $0x1], 1 }

</bundles_post_ra>
